<compile_context>
chip_gen: v7x
topology: tpu7x:2x2x1
jax: 0.10.0
libtpu: 0.0.40
codegen_flags: <defaults>
</compile_context>

<pallas_src>
import math

import numpy as np
import jax
import jax.numpy as jnp
from jax.experimental import pallas as pl
from jax.experimental.pallas import tpu as pltpu

_VMEM_TILE_BUDGET = 40 << 20    # double-buffered per-step working set budget
_VMEM_LIMIT_BYTES = 48 << 20    # < 64 MiB physical on v7x; fine on v5e/v6e


def _pick_tile_rows(bs_flat, d_flat, g_flat, out_itemsize):
    """Largest (multiple-of-8) row tile whose double-buffered working set fits."""
    per_row = 4 * d_flat + 4 * g_flat + 2 * out_itemsize * d_flat
    max_rows = max(8, (_VMEM_TILE_BUDGET // (2 * per_row)) // 8 * 8)
    # Prefer >= 8 grid steps (keeps both v7x TensorCores fed and the DMA
    # pipeline full) as long as each step keeps >= 512 rows so the ~0.35 us
    # per-step overhead stays negligible.
    eight_way = (pl.cdiv(bs_flat, 8) + 7) // 8 * 8
    tile = min(max_rows, max(512, eight_way))
    if tile >= bs_flat:
        tile = bs_flat          # single full-extent block (always layout-legal)
    return tile


def _obfuscate_kernel(x_ref, g_ref, gm_ref, masked_ref, vars_ref):
    # Group -> feature expansion.  With the block-diagonal (lane-packed) group
    # matrix the result lands directly in the lane-dense layout.  K and N are
    # small and the kernel is HBM-bound, so MXU latency hides under the DMAs.
    v = jnp.dot(g_ref[...], gm_ref[...], preferred_element_type=jnp.float32)
    vars_ref[...] = v.astype(vars_ref.dtype)
    masked_ref[...] = ((1.0 - v) * x_ref[...].astype(jnp.float32)).astype(
        masked_ref.dtype)


def _obfuscate_pallas(x_flat, groups_flat, gm_flat, tile_rows, out_dtype):
    bs_flat, d_flat = x_flat.shape
    g_flat = groups_flat.shape[1]
    n_steps = pl.cdiv(bs_flat, tile_rows)

    masked_flat, vars_flat = pl.pallas_call(
        _obfuscate_kernel,
        out_shape=(
            jax.ShapeDtypeStruct((bs_flat, d_flat), out_dtype),
            jax.ShapeDtypeStruct((bs_flat, d_flat), out_dtype),
        ),
        grid=(n_steps,),
        in_specs=[
            pl.BlockSpec((tile_rows, d_flat), lambda i: (i, 0)),
            pl.BlockSpec((tile_rows, g_flat), lambda i: (i, 0)),
            pl.BlockSpec((g_flat, d_flat), lambda i: (0, 0)),
        ],
        out_specs=(
            pl.BlockSpec((tile_rows, d_flat), lambda i: (i, 0)),
            pl.BlockSpec((tile_rows, d_flat), lambda i: (i, 0)),
        ),
        compiler_params=pltpu.CompilerParams(
            dimension_semantics=("parallel",),
            vmem_limit_bytes=_VMEM_LIMIT_BYTES,
        ),
    )(x_flat, groups_flat, gm_flat)
    return masked_flat, vars_flat


def make_random_obfuscator(pretraining_ratio, group_matrix, *, out_dtype=jnp.float32):
    """RandomObfuscator.__init__: all per-module work hoisted out of forward."""
    group_matrix = jnp.asarray(group_matrix)
    num_groups, input_dim = group_matrix.shape
    # (group_matrix > 0) + 0.0 -- binarized once, here, not per forward call.
    gm_bin = (group_matrix > 0).astype(jnp.float32)

    # Row-packing factor R so that R * input_dim is a multiple of 128
    # (lane-dense loads/stores); kron(I_R, gm_bin) is the matching
    # block-diagonal expansion so the kernel matmul emits the packed layout.
    pack = 128 // math.gcd(input_dim, 128)
    if pack > 1 and (pack * num_groups) * (pack * input_dim) * 4 > (4 << 20):
        pack = 1                 # block-diagonal matrix would get too big
    gm_packed = (jnp.kron(jnp.eye(pack, dtype=jnp.float32), gm_bin)
                 if pack > 1 else gm_bin)

    out_itemsize = jnp.dtype(out_dtype).itemsize

    def forward(x, key, *, tile_rows=None):
        bs, d = x.shape
        assert d == input_dim, f"x has {d} features, group_matrix expects {input_dim}"

        # torch.bernoulli(pretraining_ratio * ones(bs, num_groups)).
        # TODO(synk): torch's global Philox stream is not bit-reproducible here;
        # the draws match in distribution only.  Sampled with jax.random in the
        # wrapper (tiny array) instead of the in-kernel TPU hardware PRNG so the
        # kernel also lowers under the CPU/interpret fallback.
        groups = jax.random.bernoulli(
            key, pretraining_ratio, (bs, num_groups)).astype(jnp.float32)

        r = pack if (pack > 1 and bs % pack == 0) else 1
        if r > 1:
            x_flat = x.reshape(bs // r, r * d)
            g_flat = groups.reshape(bs // r, r * num_groups)
            gm_use = gm_packed
        else:
            x_flat, g_flat, gm_use = x, groups, gm_bin

        bs_flat, d_flat = x_flat.shape
        if tile_rows is None:
            tile_rows = _pick_tile_rows(bs_flat, d_flat, g_flat.shape[1],
                                        out_itemsize)

        masked_flat, vars_flat = _obfuscate_pallas(
            x_flat, g_flat, gm_use, tile_rows, out_dtype)

        masked = masked_flat.reshape(bs, d)
        obf_vars = vars_flat.reshape(bs, d)
        return masked, groups, obf_vars

    return forward


if __name__ == "__main__":
    BATCH = 256
    INPUT_DIM = 16
    NUM_GROUPS = 4
    PRETRAINING_RATIO = 0.5

    key = jax.random.PRNGKey(0)
    kx, kdraw = jax.random.split(key)
    x = jax.random.normal(kx, (BATCH, INPUT_DIM), jnp.float32)
    # Feature f belongs to group f % NUM_GROUPS, with non-binary weights so the
    # (group_matrix > 0) + 0.0 binarization from __init__ actually matters.
    group_matrix = (
        (jnp.arange(INPUT_DIM)[None, :] % NUM_GROUPS
         == jnp.arange(NUM_GROUPS)[:, None]).astype(jnp.float32) * 0.25)

    obfuscator = make_random_obfuscator(PRETRAINING_RATIO, group_matrix)
    gm_bin_np = np.asarray((group_matrix > 0).astype(jnp.float32))
    x_np = np.asarray(x)

    # Run once with the default single large tile and once forcing a
    # multi-step grid to exercise the BlockSpec index maps.
    for tile in (None, 8):
        masked, groups, obf_vars = obfuscator(x, kdraw, tile_rows=tile)
        masked = jax.block_until_ready(masked)
        groups = jax.block_until_ready(groups)
        obf_vars = jax.block_until_ready(obf_vars)

        # ---- correctness: deterministic math given the Bernoulli draws.
        g = np.asarray(groups)
        assert np.all((g == 0.0) | (g == 1.0)), "obfuscated_groups must be 0/1"
        ref_vars = g @ gm_bin_np
        assert np.allclose(np.asarray(obf_vars), ref_vars, rtol=1e-6, atol=1e-6), \
            "obfuscated_vars mismatch"
        ref_masked = (1.0 - ref_vars) * x_np
        assert np.allclose(np.asarray(masked), ref_masked, rtol=1e-6, atol=1e-6), \
            "masked_input mismatch"
        # ---- statistics: empirical Bernoulli rate close to pretraining_ratio.
        p_hat = float(g.mean())
        assert abs(p_hat - PRETRAINING_RATIO) < 0.1, f"bad Bernoulli rate {p_hat}"

    print("KERNEL_OK")
</pallas_src>

<mosaic_0001>
module attributes {stable_mosaic.version = 11 : i64} {
  func.func @_obfuscate_kernel(%arg0: i32, %arg1: memref<32x128xf32, #tpu.memory_space<vmem>>, %arg2: memref<32x32xf32, #tpu.memory_space<vmem>>, %arg3: memref<32x128xf32, #tpu.memory_space<vmem>>, %arg4: memref<32x128xf32, #tpu.memory_space<vmem>>, %arg5: memref<32x128xf32, #tpu.memory_space<vmem>>) attributes {dimension_semantics = [#tpu.dimension_semantics<parallel>], iteration_bounds = array<i64: 1>, scalar_prefetch = 0 : i64, scratch_operands = 0 : i64, tpu.core_type = #tpu.core_type<tc>, window_params = [{transform_indices = @transform_0, window_bounds = array<i64: 32, 128>}, {transform_indices = @transform_1, window_bounds = array<i64: 32, 32>}, {pipeline_mode = #tpu.pipeline_mode<synchronous>, transform_indices = @transform_2, window_bounds = array<i64: 32, 128>}, {transform_indices = @transform_3, window_bounds = array<i64: 32, 128>}, {transform_indices = @transform_4, window_bounds = array<i64: 32, 128>}]} {
    %c0 = arith.constant 0 : index
    %c0_0 = arith.constant 0 : index
    %0 = vector.load %arg2[%c0, %c0_0] : memref<32x32xf32, #tpu.memory_space<vmem>>, vector<32x32xf32>
    %c0_1 = arith.constant 0 : index
    %c0_2 = arith.constant 0 : index
    %1 = vector.load %arg3[%c0_1, %c0_2] : memref<32x128xf32, #tpu.memory_space<vmem>>, vector<32x128xf32>
    %cst = arith.constant dense<0.000000e+00> : vector<32x128xf32>
    %2 = tpu.matmul %0, %1, %cst {dimension_numbers = #tpu.dot_dimension_numbers<[1], [0], [0], [1], [0, 0, 1, 1], [], []>} : vector<32x32xf32>, vector<32x128xf32>, vector<32x128xf32> -> vector<32x128xf32>
    %c0_3 = arith.constant 0 : index
    %c0_4 = arith.constant 0 : index
    %3 = vector.load %arg5[%c0_3, %c0_4] : memref<32x128xf32, #tpu.memory_space<vmem>>, vector<32x128xf32>
    tpu.vector_store %arg5[%c0_3, %c0_4], %2 {strides = array<i32>} : memref<32x128xf32, #tpu.memory_space<vmem>>, vector<32x128xf32>,
    %cst_5 = arith.constant 1.000000e+00 : f32
    %4 = vector.broadcast %cst_5 : f32 to vector<32x128xf32>
    %5 = arith.subf %4, %2 : vector<32x128xf32>
    %c0_6 = arith.constant 0 : index
    %c0_7 = arith.constant 0 : index
    %6 = vector.load %arg1[%c0_6, %c0_7] : memref<32x128xf32, #tpu.memory_space<vmem>>, vector<32x128xf32>
    %7 = arith.mulf %5, %6 : vector<32x128xf32>
    %c0_8 = arith.constant 0 : index
    %c0_9 = arith.constant 0 : index
    %8 = vector.load %arg4[%c0_8, %c0_9] : memref<32x128xf32, #tpu.memory_space<vmem>>, vector<32x128xf32>
    tpu.vector_store %arg4[%c0_8, %c0_9], %7 {strides = array<i32>} : memref<32x128xf32, #tpu.memory_space<vmem>>, vector<32x128xf32>,
    return
  }
  func.func @transform_0(%arg0: i32) -> (i32, i32) {
    %c0_i32 = arith.constant 0 : i32
    %c0_i32_0 = arith.constant 0 : i32
    return %arg0, %c0_i32 : i32, i32
  }
  func.func @transform_1(%arg0: i32) -> (i32, i32) {
    %c0_i32 = arith.constant 0 : i32
    %c0_i32_0 = arith.constant 0 : i32
    return %arg0, %c0_i32 : i32, i32
  }
  func.func @transform_2(%arg0: i32) -> (i32, i32) {
    %c0_i32 = arith.constant 0 : i32
    %c0_i32_0 = arith.constant 0 : i32
    %c0_i32_1 = arith.constant 0 : i32
    return %c0_i32, %c0_i32_0 : i32, i32
  }
  func.func @transform_3(%arg0: i32) -> (i32, i32) {
    %c0_i32 = arith.constant 0 : i32
    %c0_i32_0 = arith.constant 0 : i32
    return %arg0, %c0_i32 : i32, i32
  }
  func.func @transform_4(%arg0: i32) -> (i32, i32) {
    %c0_i32 = arith.constant 0 : i32
    %c0_i32_0 = arith.constant 0 : i32
    return %arg0, %c0_i32 : i32, i32
  }
}

</mosaic_0001>

<bundles_post_ra>
// kernel: tpu_custom_call.1
= control target key start
LH: loop header
LB: loop body
LE: loop exit
PB: predicated region body
PF: predicated region fallthrough
CT: control target
= control target key end

     0   :  { %10 = vsyncpa [#allocation3], 0  ;;  %s507_s0 = inlined_call_operand.hbm [shape: f32[32,128], index: 0, kind: input, shape index: {}]   ;;  %s508_s1 = inlined_call_operand.hbm [shape: f32[32,32], index: 1, kind: input, shape index: {}]   ;;  %s509_s2 = inlined_call_operand.hbm [shape: f32[32,128], index: 2, kind: input, shape index: {}]   ;;  %s510_s3 = inlined_call_operand.hbm [shape: f32[32,128], index: 3, kind: output, shape index: {0}]   ;;  %s511_s4 = inlined_call_operand.hbm [shape: f32[32,128], index: 4, kind: output, shape index: {1}]  }
   0x1   :  { %11 = vsyncpa [#allocation6], 0 }
   0x2   :  { %12 = vsyncpa [#allocation4], 0 }
   0x3   :  { %13 = vsyncpa [#allocation10], 0  ;;  %s382_s15 = smov [#allocation5]   ;;  %s383_s17 = smov [#allocation2]  }
   0x4   :  { %s31_s16 = sshll.u32 %s382_s15, 4  ;;  %s19_s18 = sshll.u32 %s383_s17, 4  ;;  %s32_s16 = int_to_ptr.vmem [resolvable:$true] %s31_s16  ;;  %s414_s18 = int_to_ptr.vmem [resolvable:$true] %s19_s18 }
   0x5   :  { %s264_s21 = scalar_lea.hbm %s508_s1, 512 }
   0x6   :  { %p265_p0 = scmp.ne.s32.totalorder %s508_s1, %s264_s21  ;;  %p268_p1 = scmp.lt.u32.totalorder %s264_s21, %s508_s1 }
   0x8   :  { %p270_p2 = pnand %p268_p1, %p265_p0 }
   0xa   :  { %273 = shalt.err (!%p270_p2)
}
   0xb   :  { %s274_s26 = scalar_lea.vmem %s32_s16, 512  ;;  %p279_p4 = scmp.lt.s32.totalorder %s32_s16, %s32_s16 }
   0xc   :  { %p275_p3 = scmp.ne.s32.totalorder %s32_s16, %s274_s26  ;;  %p280_p5 = scmp.lt.s32.totalorder %s274_s26, %s274_s26 }
   0xe   :  { %p281_p6 = por %p280_p5, %p279_p4 }
  0x10   :  { %p282_p7 = pnand %p281_p6, %p275_p3 }
  0x12   :  { %285 = shalt.err (!%p282_p7)
}
  0x13   :  { %s384_s27 = smov 128   ;;  %s385_s28 = smov 8  }
  0x14   :  { %37 = dma.hbm_to_vmem [thread:$0]  %s508_s1, 512, %s32_s16, [#allocation6], %s384_s27, %s384_s27, %s385_s28  }
  0x15   :  { %s286_s7 = scalar_lea.hbm %s507_s0, 512 }
  0x16   :  { %p287_p8 = scmp.ne.s32.totalorder %s507_s0, %s286_s7  ;;  %p290_p9 = scmp.lt.u32.totalorder %s286_s7, %s507_s0 }
  0x18   :  { %p292_p10 = pnand %p290_p9, %p287_p8 }
  0x1a   :  { %295 = shalt.err (!%p292_p10)
}
  0x1b   :  { %s296_s12 = scalar_lea.vmem %s414_s18, 512  ;;  %p301_p12 = scmp.lt.s32.totalorder %s414_s18, %s414_s18 }
  0x1c   :  { %p297_p11 = scmp.ne.s32.totalorder %s414_s18, %s296_s12  ;;  %p302_p13 = scmp.lt.s32.totalorder %s296_s12, %s296_s12 }
  0x1e   :  { %p303_p0 = por %p302_p13, %p301_p12 }
  0x20   :  { %p304_p1 = pnand %p303_p0, %p297_p11 }
  0x22   :  { %307 = shalt.err (!%p304_p1)
}
  0x23   :  { %25 = dma.hbm_to_vmem [thread:$0]  %s507_s0, 512, %s414_s18, [#allocation3], %s384_s27, %s384_s27, %s385_s28  }
  0x24   :  { %s386_s14 = smov [#allocation7]   ;;  %s308_s19 = scalar_lea.hbm %s509_s2, 512 }
  0x25   :  { %s43_s15 = sshll.u32 %s386_s14, 4  ;;  %p309_p2 = scmp.ne.s32.totalorder %s509_s2, %s308_s19  ;;  %s44_s15 = int_to_ptr.vmem [resolvable:$true] %s43_s15 }
  0x26   :  { %p312_p3 = scmp.lt.u32.totalorder %s308_s19, %s509_s2 }
  0x28   :  { %p314_p4 = pnand %p312_p3, %p309_p2 }
  0x2a   :  { %317 = shalt.err (!%p314_p4)
}
  0x2b   :  { %s318_s24 = scalar_lea.vmem %s44_s15, 512  ;;  %p323_p6 = scmp.lt.s32.totalorder %s44_s15, %s44_s15 }
  0x2c   :  { %p319_p5 = scmp.ne.s32.totalorder %s44_s15, %s318_s24  ;;  %p324_p7 = scmp.lt.s32.totalorder %s318_s24, %s318_s24 }
  0x2e   :  { %p325_p8 = por %p324_p7, %p323_p6 }
  0x30   :  { %p326_p9 = pnand %p325_p8, %p319_p5 }
  0x32   :  { %329 = shalt.err (!%p326_p9)
}
  0x33   :  { %49 = dma.hbm_to_vmem [thread:$0]  %s509_s2, 512, %s44_s15, [#allocation6], %s384_s27, %s384_s27, %s385_s28  }
  0x34   :  { %374 = dma.done.wait [#allocation3], 512  }
  0x35   :  { %375 = vsyncadd [#allocation3], 4294966784 }
  0x36   :  { %376 = dma.done.wait [#allocation6], 1024  }
  0x37   :  { %377 = vsyncadd [#allocation6], 4294966272  ;;  %vm67_vm0 = vcmask 261120   ;;  %v63_v0 = vld [vmem:[#allocation7] sm:$0xff]  ;;  %v64_v1 = vld [vmem:[#allocation7 + $0x8] sm:$0xff]  ;;  %s387_s2 = smov [#allocation9]  }
  0x38   :  { %v65_v2 = vld [vmem:[#allocation7 + $0x10] sm:$0xff]  ;;  %v245_v3 = vpack.c.bf16 %v64_v1, %v63_v0  ;;  %v66_v4 = vld [vmem:[#allocation7 + $0x18] sm:$0xff]  ;;  %v59_v5 = vld [vmem:[#allocation5] sm:$0xff]  ;;  %s202_s25 = sshll.u32 %s387_s2, 4  ;;  %s388_s26 = smov [#allocation8]   ;;  %s470_s25 = int_to_ptr.vmem [resolvable:$true] %s202_s25 }
  0x39   :  { %v61_v6 = vld [vmem:[#allocation5 + $0x10] sm:$0xff]  ;;  %v249_v7 = vpack.c.bf16 %v66_v4, %v65_v2  ;;  %239 = vmatprep.mubr.msk.f32.mxu0 %vm67_vm0, %v59_v5  ;;  %v60_v8 = vld [vmem:[#allocation5 + $0x8] sm:$0xff]  ;;  %v62_v9 = vld [vmem:[#allocation5 + $0x18] sm:$0xff]  ;;  %s190_s29 = sshll.u32 %s388_s26, 4  ;;  %s330_s30 = scalar_lea.vmem %s470_s25, 512  ;;  %s191_s29 = int_to_ptr.vmem [resolvable:$true] %s190_s29 }
  0x3a   :  { %242 = vmatprep.mubr.msk.f32.mxu1 %vm67_vm0, %v61_v6  ;;  %246 = vmatprep.subr.bf16.mxu0 %v245_v3  ;;  %v174_v11 = vld [vmem:[#allocation2 + $0x8] sm:$0xff]  ;;  %v176_v13 = vld [vmem:[#allocation2 + $0x18] sm:$0xff]  ;;  %v173_v14 = vld [vmem:[#allocation2] sm:$0xff]  ;;  %p331_p10 = scmp.ne.s32.totalorder %s470_s25, %s330_s30  ;;  %p335_p11 = scmp.lt.s32.totalorder %s470_s25, %s470_s25 }
  0x3b   :  { %253 = vmatprep.subr.bf16.mxu1 %v245_v3  ;;  %248 = vmatpush3.bf16.msra.mxu0 %v245_v3  ;;  %v175_v19 = vld [vmem:[#allocation2 + $0x10] sm:$0xff]  ;;  %p336_p12 = scmp.lt.s32.totalorder %s330_s30, %s330_s30 }
  0x3c   :  { %255 = vmatpush3.bf16.msra.mxu1 %v245_v3  ;;  %250 = vmatprep.subr.bf16.mxu0 %v249_v7 }
  0x3d   :  { %254 = vmatprep.subr.bf16.mxu1 %v249_v7  ;;  %p337_p13 = por %p336_p12, %p335_p11 }
  0x3f   :  { %252 = vmatpush3.bf16.msra.mxu0 %v249_v7  ;;  %p338_p0 = pnand %p337_p13, %p331_p10 }
  0x40   :  { %256 = vmatpush3.bf16.msra.mxu1 %v249_v7 }
  0x42   :  { %240 = vmatmul.mubr.msk.f32.vlgmr.msra.gmra.mrb[0].mxu0 %vm67_vm0, %v60_v8 }
  0x43   :  { %243 = vmatmul.mubr.msk.f32.vlgmr.msra.gmra.mrb[0].mxu1 %vm67_vm0, %v62_v9 }
 0x115   :  { %v241_v10 = vpop.f32.mrb[0].mxu0 }
 0x116   :  { %v244_v12 = vpop.f32.mrb[0].mxu1  ;;  %166 = vst [vmem:[#allocation9 + $0x8] sm:$0xff] %v241_v10  ;;  %v170_v15 = vsub.f32 1.0, %v241_v10  ;;  %v146_v17 = vpop.f32.mrb[1].mxu0 }
 0x117   :  { %168 = vst [vmem:[#allocation9 + $0x18] sm:$0xff] %v244_v12  ;;  %v172_v16 = vsub.f32 1.0, %v244_v12  ;;  %v156_v18 = vpop.f32.mrb[1].mxu1  ;;  %165 = vst [vmem:[#allocation9] sm:$0xff] %v146_v17  ;;  %v169_v20 = vsub.f32 1.0, %v146_v17 }
 0x118   :  { %167 = vst [vmem:[#allocation9 + $0x10] sm:$0xff] %v156_v18  ;;  %v171_v21 = vsub.f32 1.0, %v156_v18  ;;  %v178_v22 = vmul.f32 %v174_v11, %v170_v15 }
 0x119   :  { %v180_v23 = vmul.f32 %v176_v13, %v172_v16 }
 0x11a   :  { %341 = shalt.err (!%p338_p0)
}
 0x11b   :  { %s342_s7 = scalar_lea.hbm %s511_s4, 512 }
 0x11c   :  { %p343_p1 = scmp.ne.s32.totalorder %s511_s4, %s342_s7  ;;  %p346_p2 = scmp.lt.u32.totalorder %s342_s7, %s511_s4 }
 0x11e   :  { %p348_p3 = pnand %p346_p2, %p343_p1 }
 0x120   :  { %351 = shalt.err (!%p348_p3)
}
 0x121   :  { %208 = dma.vmem_to_hbm [thread:$0]  %s470_s25, 512, %s511_s4, [#allocation10], %s384_s27, %s384_s27, %s385_s28   ;;  %v177_v24 = vmul.f32 %v173_v14, %v169_v20  ;;  %v179_v25 = vmul.f32 %v175_v19, %v171_v21  ;;  %182 = vst [vmem:[#allocation8 + $0x8] sm:$0xff] %v178_v22  ;;  %184 = vst [vmem:[#allocation8 + $0x18] sm:$0xff] %v180_v23 }
 0x122   :  { %s352_s13 = scalar_lea.vmem %s191_s29, 512  ;;  %p357_p5 = scmp.lt.s32.totalorder %s191_s29, %s191_s29 }
 0x123   :  { %181 = vst [vmem:[#allocation8] sm:$0xff] %v177_v24  ;;  %183 = vst [vmem:[#allocation8 + $0x10] sm:$0xff] %v179_v25  ;;  %p353_p4 = scmp.ne.s32.totalorder %s191_s29, %s352_s13  ;;  %p358_p6 = scmp.lt.s32.totalorder %s352_s13, %s352_s13 }
 0x125   :  { %p359_p7 = por %p358_p6, %p357_p5 }
 0x127   :  { %p360_p8 = pnand %p359_p7, %p353_p4 }
 0x129   :  { %363 = shalt.err (!%p360_p8)
}
 0x12a   :  { %s364_s16 = scalar_lea.hbm %s510_s3, 512 }
 0x12b   :  { %p365_p9 = scmp.ne.s32.totalorder %s510_s3, %s364_s16  ;;  %p368_p10 = scmp.lt.u32.totalorder %s364_s16, %s510_s3 }
 0x12d   :  { %p370_p11 = pnand %p368_p10, %p365_p9 }
 0x12f   :  { %373 = shalt.err (!%p370_p11)
}
 0x130   :  { %196 = dma.vmem_to_hbm [thread:$0]  %s191_s29, 512, %s510_s3, [#allocation4], %s384_s27, %s384_s27, %s385_s28  }
 0x131   :  { %378 = dma.done.wait [#allocation4], 512  }
 0x132   :  { %379 = vsyncadd [#allocation4], 4294966784 }
 0x133   :  { %380 = dma.done.wait [#allocation10], 512  }
 0x134   :  { %381 = vsyncadd [#allocation10], 4294966784 }
 0x135   :  { %215 = vsyncpa [#allocation3], 1 }
 0x136   :  { %216 = vsyncpa [#allocation6], 1 }
 0x137   :  { %217 = vsyncpa [#allocation4], 1 }
 0x138   :  { %218 = vsyncpa [#allocation10], 1 }

</bundles_post_ra>
